<compile_context>
chip_gen: v7x
topology: tpu7x:2x2x1
jax: 0.10.0
libtpu: 0.0.40
codegen_flags: <defaults>
</compile_context>

<pallas_src>
import functools

import jax
import jax.numpy as jnp
from jax.experimental import pallas as pl
from jax.experimental.pallas import tpu as pltpu


def _focal_ce_partial_kernel(labels_ref, logits_ref, partial_ref, *, n_rows, block_rows):
    """Per-tile partial sum of cross-entropy: sum_i (logsumexp(x_i) - x_i[label_i])."""
    i = pl.program_id(0)

    logits = logits_ref[...].astype(jnp.float32)            # (TN, C)  upcast once per tile
    labels = labels_ref[...]                                 # (TN, 1)  int32

    # Numerically-stable row-wise logsumexp.
    m = jnp.max(logits, axis=-1, keepdims=True)              # (TN, 1)
    lse = m + jnp.log(jnp.sum(jnp.exp(logits - m), axis=-1, keepdims=True))  # (TN, 1)

    # Pick the true-class logit with a lane-wise compare + masked reduce (no f32 one-hot).
    class_ids = jax.lax.broadcasted_iota(jnp.int32, logits.shape, 1)          # (TN, C)
    picked = jnp.sum(jnp.where(class_ids == labels, logits, 0.0),
                     axis=-1, keepdims=True)                                  # (TN, 1)

    per_sample = lse - picked                                                 # (TN, 1)

    # Mask rows that fall past the real batch (padded last tile reads garbage).
    row_ids = i * block_rows + jax.lax.broadcasted_iota(jnp.int32, per_sample.shape, 0)
    per_sample = jnp.where(row_ids < n_rows, per_sample, 0.0)

    # Lane-dense splat of the per-tile partial CE sum into this block's (1, 8, 128) slab.
    psum = jnp.sum(per_sample, axis=0, keepdims=True)                         # (1, 1)
    partial_ref[...] = jnp.broadcast_to(psum.reshape(1, 1, 1), partial_ref.shape)


def focal_loss(y_pred, y_true, *, gamma=0.25, eps=1e-07, block_rows=None):
    """Pallas TPU implementation of FocalLoss.forward (weight=None, reduction='mean')."""
    del eps  # defined in the PyTorch module but never used in forward

    # torch.squeeze(y_true).long() equivalent, robust to (N,), (N,1) and N==1.
    labels = y_true.reshape(-1, 1).astype(jnp.int32)
    logits = y_pred                                  # keep native dtype through HBM->VMEM
    n, c = logits.shape

    if block_rows is None:
        # Aim for ~2 MiB per logits tile (85%+ of HBM roofline), capped at 1024 rows,
        # never smaller than 8 rows, and no bigger than the (8-padded) batch.
        itemsize = jnp.dtype(logits.dtype).itemsize
        tn = (2 * 1024 * 1024 // max(c * itemsize, 1)) // 8 * 8
        tn = int(max(8, min(1024, tn)))
    else:
        tn = int(block_rows)
        assert tn % 8 == 0, "block_rows must be a multiple of 8"
    tn = min(tn, ((n + 7) // 8) * 8)

    num_blocks = pl.cdiv(n, tn)

    kernel = functools.partial(_focal_ce_partial_kernel, n_rows=n, block_rows=tn)

    partials = pl.pallas_call(
        kernel,
        out_shape=jax.ShapeDtypeStruct((num_blocks, 8, 128), jnp.float32),
        grid=(num_blocks,),
        in_specs=[
            pl.BlockSpec((tn, 1), lambda i: (i, 0)),     # labels tile (TN, 1) int32
            pl.BlockSpec((tn, c), lambda i: (i, 0)),     # logits tile (TN, C) native dtype
        ],
        out_specs=pl.BlockSpec((1, 8, 128), lambda i: (i, 0, 0)),
        compiler_params=pltpu.CompilerParams(
            dimension_semantics=("parallel",),           # independent blocks -> megacore OK
        ),
    )(labels, logits)

    # O(1) epilogue in the wrapper: mean CE, then focal modulation (done exactly once).
    ce_sum = jnp.sum(partials[:, 0, 0])
    logp = ce_sum / jnp.float32(n)
    p = jnp.exp(-logp)
    # logp can round to a tiny negative -> (1 - p) slightly negative -> NaN under a
    # fractional power; clamp to keep the exact-math semantics.
    loss = jnp.maximum(1.0 - p, 0.0) ** jnp.float32(gamma) * logp
    return loss


def _reference_focal_loss(y_pred, y_true, gamma=0.25):
    # Pure-JAX reference for sanity checking.
    labels = y_true.reshape(-1).astype(jnp.int32)
    logz = jax.nn.logsumexp(y_pred.astype(jnp.float32), axis=-1)
    picked = jnp.take_along_axis(y_pred.astype(jnp.float32), labels[:, None], axis=-1)[:, 0]
    logp = jnp.mean(logz - picked)
    p = jnp.exp(-logp)
    return jnp.maximum(1.0 - p, 0.0) ** gamma * logp


if __name__ == "__main__":
    key = jax.random.PRNGKey(0)

    # Case 1: small, single-tile (N=8, C=32).
    k1, k2, k3, k4 = jax.random.split(key, 4)
    N1, C1 = 8, 32
    y_pred1 = jax.random.normal(k1, (N1, C1), dtype=jnp.float32)
    y_true1 = jax.random.randint(k2, (N1, 1), minval=0, maxval=C1, dtype=jnp.int32)

    loss1 = focal_loss(y_pred1, y_true1, gamma=0.25)
    jax.block_until_ready(loss1)
    ref1 = _reference_focal_loss(y_pred1, y_true1, gamma=0.25)
    assert jnp.allclose(loss1, ref1, atol=1e-5, rtol=1e-5), (loss1, ref1)

    # Case 2: multi-tile with a padded last tile (N=40, forced 16-row tiles -> 3 blocks),
    # exercising the grid pipeline, the row mask, and the partial-sum reduction.
    N2, C2 = 40, 32
    y_pred2 = jax.random.normal(k3, (N2, C2), dtype=jnp.float32)
    y_true2 = jax.random.randint(k4, (N2, 1), minval=0, maxval=C2, dtype=jnp.int32)

    loss2 = focal_loss(y_pred2, y_true2, gamma=0.25, block_rows=16)
    jax.block_until_ready(loss2)
    ref2 = _reference_focal_loss(y_pred2, y_true2, gamma=0.25)
    assert jnp.allclose(loss2, ref2, atol=1e-5, rtol=1e-5), (loss2, ref2)

    print("KERNEL_OK")
</pallas_src>

<mosaic_0001>
module attributes {stable_mosaic.version = 11 : i64} {
  func.func @_focal_ce_partial_kernel(%arg0: i32, %arg1: memref<8x1xi32, #tpu.memory_space<vmem>>, %arg2: memref<8x32xf32, #tpu.memory_space<vmem>>, %arg3: memref<1x8x128xf32, #tpu.memory_space<vmem>>) attributes {dimension_semantics = [#tpu.dimension_semantics<parallel>], iteration_bounds = array<i64: 1>, scalar_prefetch = 0 : i64, scratch_operands = 0 : i64, tpu.core_type = #tpu.core_type<tc>, window_params = [{transform_indices = @transform_0, window_bounds = array<i64: 8, 1>}, {transform_indices = @transform_1, window_bounds = array<i64: 8, 32>}, {transform_indices = @transform_2, window_bounds = array<i64: 1, 8, 128>}]} {
    %c0 = arith.constant 0 : index
    %c0_0 = arith.constant 0 : index
    %0 = vector.load %arg2[%c0, %c0_0] : memref<8x32xf32, #tpu.memory_space<vmem>>, vector<8x32xf32>
    %c0_1 = arith.constant 0 : index
    %c0_2 = arith.constant 0 : index
    %1 = vector.load %arg1[%c0_1, %c0_2] : memref<8x1xi32, #tpu.memory_space<vmem>>, vector<8x1xi32>
    %cst = arith.constant dense<0xFF800000> : vector<8xf32>
    %2 = vector.multi_reduction <maximumf>, %0, %cst [1] : vector<8x32xf32> to vector<8xf32>
    %3 = vector.shape_cast %2 : vector<8xf32> to vector<8x1xf32>
    %4 = vector.broadcast %3 : vector<8x1xf32> to vector<8x32xf32>
    %5 = arith.subf %0, %4 : vector<8x32xf32>
    %6 = math.exp %5 : vector<8x32xf32>
    %cst_3 = arith.constant dense<0.000000e+00> : vector<8xf32>
    %7 = vector.multi_reduction <add>, %6, %cst_3 [1] : vector<8x32xf32> to vector<8xf32>
    %8 = vector.shape_cast %7 : vector<8xf32> to vector<8x1xf32>
    %9 = math.log %8 : vector<8x1xf32>
    %10 = arith.addf %3, %9 : vector<8x1xf32>
    %11 = tpu.iota {dimensions = array<i32: 1>} : vector<8x32xi32>
    %12 = vector.broadcast %1 : vector<8x1xi32> to vector<8x32xi32>
    %13 = arith.cmpi eq, %11, %12 : vector<8x32xi32>
    %cst_4 = arith.constant 0.000000e+00 : f32
    %14 = vector.broadcast %cst_4 : f32 to vector<8x32xf32>
    %15 = arith.select %13, %0, %14 : vector<8x32xi1>, vector<8x32xf32>
    %cst_5 = arith.constant dense<0.000000e+00> : vector<8xf32>
    %16 = vector.multi_reduction <add>, %15, %cst_5 [1] : vector<8x32xf32> to vector<8xf32>
    %17 = vector.shape_cast %16 : vector<8xf32> to vector<8x1xf32>
    %18 = arith.subf %10, %17 : vector<8x1xf32>
    %c8_i32 = arith.constant 8 : i32
    %19 = arith.muli %arg0, %c8_i32 : i32
    %20 = tpu.iota {dimensions = array<i32: 0>} : vector<8x1xi32>
    %21 = vector.broadcast %19 : i32 to vector<8x1xi32>
    %22 = arith.addi %21, %20 : vector<8x1xi32>
    %c8_i32_6 = arith.constant 8 : i32
    %23 = vector.broadcast %c8_i32_6 : i32 to vector<8x1xi32>
    %24 = arith.cmpi slt, %22, %23 : vector<8x1xi32>
    %cst_7 = arith.constant 0.000000e+00 : f32
    %25 = vector.broadcast %cst_7 : f32 to vector<8x1xf32>
    %26 = arith.select %24, %18, %25 : vector<8x1xi1>, vector<8x1xf32>
    %cst_8 = arith.constant dense<0.000000e+00> : vector<1xf32>
    %27 = vector.multi_reduction <add>, %26, %cst_8 [0] : vector<8x1xf32> to vector<1xf32>
    %28 = vector.shape_cast %27 : vector<1xf32> to vector<1x1xf32>
    %29 = vector.shape_cast %28 : vector<1x1xf32> to vector<1x1x1xf32>
    %30 = vector.shape_cast %29 : vector<1x1x1xf32> to vector<1x1x1xf32>
    %31 = vector.broadcast %30 : vector<1x1x1xf32> to vector<1x8x128xf32>
    %c0_9 = arith.constant 0 : index
    %c0_10 = arith.constant 0 : index
    %c0_11 = arith.constant 0 : index
    %32 = vector.load %arg3[%c0_9, %c0_10, %c0_11] : memref<1x8x128xf32, #tpu.memory_space<vmem>>, vector<1x8x128xf32>
    tpu.vector_store %arg3[%c0_9, %c0_10, %c0_11], %31 {strides = array<i32>} : memref<1x8x128xf32, #tpu.memory_space<vmem>>, vector<1x8x128xf32>,
    return
  }
  func.func @transform_0(%arg0: i32) -> (i32, i32) {
    %c0_i32 = arith.constant 0 : i32
    %c0_i32_0 = arith.constant 0 : i32
    return %arg0, %c0_i32 : i32, i32
  }
  func.func @transform_1(%arg0: i32) -> (i32, i32) {
    %c0_i32 = arith.constant 0 : i32
    %c0_i32_0 = arith.constant 0 : i32
    return %arg0, %c0_i32 : i32, i32
  }
  func.func @transform_2(%arg0: i32) -> (i32, i32, i32) {
    %c0_i32 = arith.constant 0 : i32
    %c0_i32_0 = arith.constant 0 : i32
    %c0_i32_1 = arith.constant 0 : i32
    return %arg0, %c0_i32, %c0_i32_0 : i32, i32, i32
  }
}

</mosaic_0001>

<bundles_post_ra>
// kernel: tpu_custom_call.1
= control target key start
LH: loop header
LB: loop body
LE: loop exit
PB: predicated region body
PF: predicated region fallthrough
CT: control target
= control target key end

     0   :  { %vm14_vm0 = vcmask 261120   ;;  %s135_s0 = inlined_call_operand.vmem [shape: s32[8,1], index: 0, kind: input, shape index: {}]   ;;  %s136_s1 = inlined_call_operand.vmem [shape: f32[8,32], index: 1, kind: input, shape index: {}]   ;;  %s137_s2 = inlined_call_operand.hbm [shape: f32[1,8,128], index: 2, kind: output, shape index: {}]  }
   0x1   :  { %v12_v0 = vld [vmem:[%s136_s1] sm:$0xff] }
   0x2   :  { %7 = vsyncpa [#allocation3], 0  ;;  %v15_v1 = vsel %vm14_vm0, %v12_v0, -inf  ;;  %v97_v2 = vmov 0   ;;  %v13_v3 = vld [vmem:[%s135_s0] sm:$0xff]  ;;  %v27_v7 = vlaneseq  ;;  %s98_s0 = smov [#allocation2]  }
   0x3   :  { %68 = vset.pattern.permute.xlu0 %v97_v2  ;;  %s58_s1 = sshll.u32 %s98_s0, 4  ;;  %s59_s1 = int_to_ptr.vmem [resolvable:$true] %s58_s1 }
   0x4   :  { %16 = vmax.xlane.f32.xlu0 %v15_v1  ;;  %v28_v8 = vand.u32 127, %v27_v7  ;;  %s73_s13 = scalar_lea.vmem %s59_s1, 128  ;;  %p78_p1 = scmp.lt.s32.totalorder %s59_s1, %s59_s1 }
   0x5   :  { %p74_p0 = scmp.ne.s32.totalorder %s59_s1, %s73_s13  ;;  %p79_p2 = scmp.lt.s32.totalorder %s73_s13, %s73_s13 }
   0x7   :  { %p80_p3 = por %p79_p2, %p78_p1 }
   0x9   :  { %p81_p4 = pnand %p80_p3, %p74_p0 }
  0x1a   :  { %30 = vperm.xlu0 %68, %v13_v3  }
  0x91   :  { %v17_v4 = vpop.xlane.xlu0 %16 }
  0x92   :  { %v18_v5 = vsub.f32 %v12_v0, %v17_v4 }
  0x94   :  { %v19_v6 = vmul.f32 1.442695, %v18_v5 }
  0x96   :  { %69 = vpow2.f32 %v19_v6 }
  0x99   :  { %v31_v9 = vpop.permute.xlu0 %30 }
  0x9a   :  { %vm32_vm1 = vcmp.eq.s32.totalorder %v28_v8, %v31_v9 }
  0x9b   :  { %v33_v11 = vsel %vm32_vm1, %v12_v0, 0.0 }
  0x9c   :  { %v34_v13 = vsel %vm14_vm0, %v33_v11, 0.0 }
  0xa0   :  { %v70_v10 = vpop.eup %69 }
  0xa1   :  { %v21_v12 = vsel %vm14_vm0, %v70_v10, 0.0 }
  0xa2   :  { %22 = vadd.xlane.f32.xlu1 %v21_v12 }
  0xa6   :  { %35 = vadd.xlane.f32.xlu1 %v34_v13 }
 0x12f   :  { %v23_v14 = vpop.xlane.xlu1 %22 }
 0x130   :  { %71 = vlog2.f32 %v23_v14 }
 0x133   :  { %v36_v17 = vpop.xlane.xlu1 %35 }
 0x13a   :  { %v72_v15 = vpop.eup %71 }
 0x13b   :  { %v25_v16 = vmul.f32 0.6931472, %v72_v15 }
 0x13d   :  { %v26_v18 = vadd.f32 %v25_v16, %v17_v4 }
 0x13f   :  { %v37_v19 = vsub.f32 %v26_v18, %v36_v17 }
 0x141   :  { %v45_v20 = vrot.slane %v37_v19, 4 }
 0x143   :  { %v46_v21 = vadd.f32 %v45_v20, %v37_v19 }
 0x145   :  { %v47_v22 = vrot.slane %v46_v21, 2 }
 0x147   :  { %v48_v23 = vadd.f32 %v47_v22, %v46_v21 }
 0x149   :  { %v49_v24 = vrot.slane %v48_v23, 1 }
 0x14b   :  { %v50_v25 = vadd.f32 %v49_v24, %v48_v23 }
 0x14d   :  { %51 = vst [vmem:[#allocation2] sm:$0xff] %v50_v25 }
 0x14e   :  { %84 = shalt.err (!%p81_p4)
}
 0x14f   :  { %s85_s16 = scalar_lea.hbm %s137_s2, 128 }
 0x150   :  { %p86_p5 = scmp.ne.s32.totalorder %s137_s2, %s85_s16  ;;  %p89_p6 = scmp.lt.u32.totalorder %s85_s16, %s137_s2 }
 0x152   :  { %p91_p7 = pnand %p89_p6, %p86_p5 }
 0x154   :  { %94 = shalt.err (!%p91_p7)
}
 0x155   :  { %61 = dma.vmem_to_hbm [thread:$0]  %s59_s1, 128, %s137_s2, [#allocation3]  }
 0x156   :  { %95 = dma.done.wait [#allocation3], 128  }
 0x157   :  { %96 = vsyncadd [#allocation3], 4294967168 }
 0x158   :  { %65 = vsyncpa [#allocation3], 1 }

</bundles_post_ra>
